<compile_context>
chip_gen: v5e
topology: v5e:2x2
jax: 0.10.0
libtpu: 0.0.40
codegen_flags: <defaults>
</compile_context>

<pallas_src>
import jax
import jax.numpy as jnp
from jax.experimental import pallas as pl
from jax.experimental.pallas import tpu as pltpu

# ---- module hyper-parameters (small, consistent with the module) -----------
HALF_IN_SIZE = 64                 # round(num_ftrs / 2); small synthetic value
NUM_FTRS = 2 * HALF_IN_SIZE       # 128
LAYER_WIDTH = 102                 # fixed in the original script
NUM_CLASS = 176                   # fixed in the original script
BATCH = 8                         # dataloader batch_size in the original script

L_PAD = 128                       # layer_width padded to one lane tile
C_PAD = 256                       # Num_class padded to two lane tiles


def _round_up(a, m):
    return (a + m - 1) // m * m


# --------------------------------------------------------------------------
# Kernel: whole SpinalNet head fused, one grid step per batch tile.
# --------------------------------------------------------------------------
def _spinal_kernel(x_ref, w_in_ref, b_pre_ref, w_chain_ref, w_out_ref, b_out_ref,
                   out_ref):
    f32 = jnp.float32
    bf16 = jnp.bfloat16
    Lp = L_PAD

    x = x_ref[...].astype(bf16)                                    # [TB, 128]

    # One wide dot (K=128, N=512) for all four data-independent projections,
    # with the four spinal biases folded into the lane-packed bias row.
    pre = jnp.dot(x, w_in_ref[...], preferred_element_type=f32) + b_pre_ref[...]

    # Serial spinal chain: only the x_{i-1} @ W_i^b dots (128x128) remain.
    x1 = jnp.maximum(pre[:, 0 * Lp:1 * Lp], 0.0)
    x2 = jnp.maximum(
        pre[:, 1 * Lp:2 * Lp]
        + jnp.dot(x1.astype(bf16), w_chain_ref[0], preferred_element_type=f32), 0.0)
    x3 = jnp.maximum(
        pre[:, 2 * Lp:3 * Lp]
        + jnp.dot(x2.astype(bf16), w_chain_ref[1], preferred_element_type=f32), 0.0)
    x4 = jnp.maximum(
        pre[:, 3 * Lp:4 * Lp]
        + jnp.dot(x3.astype(bf16), w_chain_ref[2], preferred_element_type=f32), 0.0)

    # Single K=512, N=256 output projection (x1..x4 are lane-aligned 128-wide blocks).
    h = jnp.concatenate([x1, x2, x3, x4], axis=1).astype(bf16)     # [TB, 512]
    out = jnp.dot(h, w_out_ref[...], preferred_element_type=f32) + b_out_ref[...]
    out_ref[...] = out.astype(out_ref.dtype)


# --------------------------------------------------------------------------
# Wrapper
# --------------------------------------------------------------------------
@jax.jit
def spinal_forward(x, packed):
    """x: [B, 2*half] f32; packed: dict from pack_params (bf16 weights, f32 biases)."""
    B = x.shape[0]
    B_pad = _round_up(B, 8)
    TB = B_pad if B_pad <= 256 else 256
    B_pad = _round_up(B_pad, TB)
    if B_pad != B:
        x = jnp.pad(x, ((0, B_pad - B), (0, 0)))

    out = pl.pallas_call(
        _spinal_kernel,
        out_shape=jax.ShapeDtypeStruct((B_pad, C_PAD), jnp.float32),
        grid=(B_pad // TB,),
        in_specs=[
            pl.BlockSpec((TB, NUM_FTRS), lambda i: (i, 0)),          # x tile
            pl.BlockSpec((NUM_FTRS, 4 * L_PAD), lambda i: (0, 0)),   # W_in
            pl.BlockSpec((1, 4 * L_PAD), lambda i: (0, 0)),          # packed spinal biases
            pl.BlockSpec((3, L_PAD, L_PAD), lambda i: (0, 0, 0)),    # chain weights
            pl.BlockSpec((4 * L_PAD, C_PAD), lambda i: (0, 0)),      # W_out
            pl.BlockSpec((1, C_PAD), lambda i: (0, 0)),              # output bias
        ],
        out_specs=pl.BlockSpec((TB, C_PAD), lambda i: (i, 0)),
        compiler_params=pltpu.CompilerParams(
            dimension_semantics=("parallel",)),
    )(x, packed["w_in"], packed["b_pre"], packed["w_chain"],
      packed["w_out"], packed["b_out"])

    return out[:B, :NUM_CLASS]


# --------------------------------------------------------------------------
# Parameter init (PyTorch nn.Linear layout, weights stored [in, out]) and
# one-time packing into the padded / fused kernel layout.
# --------------------------------------------------------------------------
def init_params(key):
    def linear(key, fan_in, fan_out):
        kw, kb = jax.random.split(key)
        bound = 1.0 / jnp.sqrt(fan_in)
        w = jax.random.uniform(kw, (fan_in, fan_out), jnp.float32, -bound, bound)
        b = jax.random.uniform(kb, (1, fan_out), jnp.float32, -bound, bound)
        return w, b

    keys = jax.random.split(key, 5)
    half, L, C = HALF_IN_SIZE, LAYER_WIDTH, NUM_CLASS
    w1, b1 = linear(keys[0], half, L)
    w2, b2 = linear(keys[1], half + L, L)
    w3, b3 = linear(keys[2], half + L, L)
    w4, b4 = linear(keys[3], half + L, L)
    wo, bo = linear(keys[4], 4 * L, C)
    return dict(w1=w1, b1=b1, w2=w2, b2=b2, w3=w3, b3=b3, w4=w4, b4=b4,
                wo=wo, bo=bo)


def pack_params(p):
    """Pad to lane multiples of 128 and fuse into 3 weight slabs + 2 bias rows (done once)."""
    half, L, C = HALF_IN_SIZE, LAYER_WIDTH, NUM_CLASS
    Lp, Cp = L_PAD, C_PAD
    f32, bf16 = jnp.float32, jnp.bfloat16

    # W_in: all data-independent projections, one per 128-lane output block.
    w_in = jnp.zeros((2 * half, 4 * Lp), f32)
    w_in = w_in.at[:half, 0 * Lp:0 * Lp + L].set(p["w1"])            # xa -> x1 pre
    w_in = w_in.at[half:, 1 * Lp:1 * Lp + L].set(p["w2"][:half])     # xb -> x2 pre
    w_in = w_in.at[:half, 2 * Lp:2 * Lp + L].set(p["w3"][:half])     # xa -> x3 pre
    w_in = w_in.at[half:, 3 * Lp:3 * Lp + L].set(p["w4"][:half])     # xb -> x4 pre

    b_pre = jnp.zeros((1, 4 * Lp), f32)
    b_pre = b_pre.at[:, 0 * Lp:0 * Lp + L].set(p["b1"])
    b_pre = b_pre.at[:, 1 * Lp:1 * Lp + L].set(p["b2"])
    b_pre = b_pre.at[:, 2 * Lp:2 * Lp + L].set(p["b3"])
    b_pre = b_pre.at[:, 3 * Lp:3 * Lp + L].set(p["b4"])

    # Serial-chain weights (the x_{i-1} part of layers 2..4).
    w_chain = jnp.zeros((3, Lp, Lp), f32)
    w_chain = w_chain.at[0, :L, :L].set(p["w2"][half:])
    w_chain = w_chain.at[1, :L, :L].set(p["w3"][half:])
    w_chain = w_chain.at[2, :L, :L].set(p["w4"][half:])

    # Output projection, one K=512 slab.
    w_out = jnp.zeros((4 * Lp, Cp), f32)
    for k in range(4):
        w_out = w_out.at[k * Lp:k * Lp + L, :C].set(p["wo"][k * L:(k + 1) * L])
    b_out = jnp.zeros((1, Cp), f32)
    b_out = b_out.at[:, :C].set(p["bo"])

    return dict(w_in=w_in.astype(bf16), b_pre=b_pre,
                w_chain=w_chain.astype(bf16),
                w_out=w_out.astype(bf16), b_out=b_out)


def reference_forward(x, p):
    """Pure-JAX f32 reference mirroring the PyTorch forward (explicit concats)."""
    hp = jax.lax.Precision.HIGHEST
    half = HALF_IN_SIZE
    xa = x[:, :half]
    xb = x[:, half:2 * half]
    x1 = jax.nn.relu(jnp.dot(xa, p["w1"], precision=hp) + p["b1"])
    x2 = jax.nn.relu(jnp.dot(jnp.concatenate([xb, x1], 1), p["w2"], precision=hp) + p["b2"])
    x3 = jax.nn.relu(jnp.dot(jnp.concatenate([xa, x2], 1), p["w3"], precision=hp) + p["b3"])
    x4 = jax.nn.relu(jnp.dot(jnp.concatenate([xb, x3], 1), p["w4"], precision=hp) + p["b4"])
    cat = jnp.concatenate([x1, x2, x3, x4], 1)
    return jnp.dot(cat, p["wo"], precision=hp) + p["bo"]


if __name__ == "__main__":
    key = jax.random.PRNGKey(0)
    kx, kp = jax.random.split(key)
    x = jax.random.normal(kx, (BATCH, NUM_FTRS), jnp.float32)
    params = init_params(kp)
    packed = pack_params(params)          # one-time packing, outside jit

    out = jax.block_until_ready(spinal_forward(x, packed))
    ref = reference_forward(x, params)

    assert out.shape == (BATCH, NUM_CLASS), out.shape
    # bf16 weights/activation casts inside the kernel -> slightly looser tolerance vs f32 ref.
    max_err = float(jnp.max(jnp.abs(out - ref)))
    assert jnp.allclose(out, ref, atol=2e-2, rtol=2e-2), f"mismatch vs reference (max abs err {max_err})"

    print("KERNEL_OK")
</pallas_src>

<mosaic_0001>
module attributes {stable_mosaic.version = 11 : i64} {
  func.func @_spinal_kernel(%arg0: i32, %arg1: memref<8x128xf32, #tpu.memory_space<vmem>>, %arg2: memref<128x512xbf16, #tpu.memory_space<vmem>>, %arg3: memref<1x512xf32, #tpu.memory_space<vmem>>, %arg4: memref<3x128x128xbf16, #tpu.memory_space<vmem>>, %arg5: memref<512x256xbf16, #tpu.memory_space<vmem>>, %arg6: memref<1x256xf32, #tpu.memory_space<vmem>>, %arg7: memref<8x256xf32, #tpu.memory_space<vmem>>) attributes {dimension_semantics = [#tpu.dimension_semantics<parallel>], iteration_bounds = array<i64: 1>, scalar_prefetch = 0 : i64, scratch_operands = 0 : i64, tpu.core_type = #tpu.core_type<tc>, window_params = [{transform_indices = @transform_0, window_bounds = array<i64: 8, 128>}, {pipeline_mode = #tpu.pipeline_mode<synchronous>, transform_indices = @transform_1, window_bounds = array<i64: 128, 512>}, {pipeline_mode = #tpu.pipeline_mode<synchronous>, transform_indices = @transform_2, window_bounds = array<i64: 1, 512>}, {pipeline_mode = #tpu.pipeline_mode<synchronous>, transform_indices = @transform_3, window_bounds = array<i64: 3, 128, 128>}, {pipeline_mode = #tpu.pipeline_mode<synchronous>, transform_indices = @transform_4, window_bounds = array<i64: 512, 256>}, {pipeline_mode = #tpu.pipeline_mode<synchronous>, transform_indices = @transform_5, window_bounds = array<i64: 1, 256>}, {transform_indices = @transform_6, window_bounds = array<i64: 8, 256>}]} {
    %c0 = arith.constant 0 : index
    %c0_0 = arith.constant 0 : index
    %0 = vector.load %arg1[%c0, %c0_0] : memref<8x128xf32, #tpu.memory_space<vmem>>, vector<8x128xf32>
    %1 = arith.truncf %0 : vector<8x128xf32> to vector<8x128xbf16>
    %c0_1 = arith.constant 0 : index
    %c0_2 = arith.constant 0 : index
    %2 = vector.load %arg2[%c0_1, %c0_2] : memref<128x512xbf16, #tpu.memory_space<vmem>>, vector<128x512xbf16>
    %cst = arith.constant dense<0.000000e+00> : vector<8x512xf32>
    %3 = tpu.matmul %1, %2, %cst {dimension_numbers = #tpu.dot_dimension_numbers<[1], [0], [0], [1], [0, 0, 1, 1], [], []>} : vector<8x128xbf16>, vector<128x512xbf16>, vector<8x512xf32> -> vector<8x512xf32>
    %c0_3 = arith.constant 0 : index
    %c0_4 = arith.constant 0 : index
    %4 = vector.load %arg3[%c0_3, %c0_4] : memref<1x512xf32, #tpu.memory_space<vmem>>, vector<1x512xf32>
    %5 = vector.broadcast %4 : vector<1x512xf32> to vector<8x512xf32>
    %6 = arith.addf %3, %5 : vector<8x512xf32>
    %7 = vector.extract_strided_slice %6 {offsets = [0, 0], sizes = [8, 128], strides = [1, 1]} : vector<8x512xf32> to vector<8x128xf32>
    %cst_5 = arith.constant 0.000000e+00 : f32
    %8 = vector.broadcast %cst_5 : f32 to vector<8x128xf32>
    %9 = arith.maximumf %7, %8 : vector<8x128xf32>
    %10 = vector.extract_strided_slice %6 {offsets = [0, 128], sizes = [8, 128], strides = [1, 1]} : vector<8x512xf32> to vector<8x128xf32>
    %11 = arith.truncf %9 : vector<8x128xf32> to vector<8x128xbf16>
    %c0_6 = arith.constant 0 : index
    %c0_7 = arith.constant 0 : index
    %c0_8 = arith.constant 0 : index
    %12 = vector.load %arg4[%c0_6, %c0_7, %c0_8] : memref<3x128x128xbf16, #tpu.memory_space<vmem>>, vector<1x128x128xbf16>
    %13 = vector.shape_cast %12 : vector<1x128x128xbf16> to vector<128x128xbf16>
    %cst_9 = arith.constant dense<0.000000e+00> : vector<8x128xf32>
    %14 = tpu.matmul %11, %13, %cst_9 {dimension_numbers = #tpu.dot_dimension_numbers<[1], [0], [0], [1], [0, 0, 1, 1], [], []>} : vector<8x128xbf16>, vector<128x128xbf16>, vector<8x128xf32> -> vector<8x128xf32>
    %15 = arith.addf %10, %14 : vector<8x128xf32>
    %cst_10 = arith.constant 0.000000e+00 : f32
    %16 = vector.broadcast %cst_10 : f32 to vector<8x128xf32>
    %17 = arith.maximumf %15, %16 : vector<8x128xf32>
    %18 = vector.extract_strided_slice %6 {offsets = [0, 256], sizes = [8, 128], strides = [1, 1]} : vector<8x512xf32> to vector<8x128xf32>
    %19 = arith.truncf %17 : vector<8x128xf32> to vector<8x128xbf16>
    %c1 = arith.constant 1 : index
    %c0_11 = arith.constant 0 : index
    %c0_12 = arith.constant 0 : index
    %20 = vector.load %arg4[%c1, %c0_11, %c0_12] : memref<3x128x128xbf16, #tpu.memory_space<vmem>>, vector<1x128x128xbf16>
    %21 = vector.shape_cast %20 : vector<1x128x128xbf16> to vector<128x128xbf16>
    %cst_13 = arith.constant dense<0.000000e+00> : vector<8x128xf32>
    %22 = tpu.matmul %19, %21, %cst_13 {dimension_numbers = #tpu.dot_dimension_numbers<[1], [0], [0], [1], [0, 0, 1, 1], [], []>} : vector<8x128xbf16>, vector<128x128xbf16>, vector<8x128xf32> -> vector<8x128xf32>
    %23 = arith.addf %18, %22 : vector<8x128xf32>
    %cst_14 = arith.constant 0.000000e+00 : f32
    %24 = vector.broadcast %cst_14 : f32 to vector<8x128xf32>
    %25 = arith.maximumf %23, %24 : vector<8x128xf32>
    %26 = vector.extract_strided_slice %6 {offsets = [0, 384], sizes = [8, 128], strides = [1, 1]} : vector<8x512xf32> to vector<8x128xf32>
    %27 = arith.truncf %25 : vector<8x128xf32> to vector<8x128xbf16>
    %c2 = arith.constant 2 : index
    %c0_15 = arith.constant 0 : index
    %c0_16 = arith.constant 0 : index
    %28 = vector.load %arg4[%c2, %c0_15, %c0_16] : memref<3x128x128xbf16, #tpu.memory_space<vmem>>, vector<1x128x128xbf16>
    %29 = vector.shape_cast %28 : vector<1x128x128xbf16> to vector<128x128xbf16>
    %cst_17 = arith.constant dense<0.000000e+00> : vector<8x128xf32>
    %30 = tpu.matmul %27, %29, %cst_17 {dimension_numbers = #tpu.dot_dimension_numbers<[1], [0], [0], [1], [0, 0, 1, 1], [], []>} : vector<8x128xbf16>, vector<128x128xbf16>, vector<8x128xf32> -> vector<8x128xf32>
    %31 = arith.addf %26, %30 : vector<8x128xf32>
    %cst_18 = arith.constant 0.000000e+00 : f32
    %32 = vector.broadcast %cst_18 : f32 to vector<8x128xf32>
    %33 = arith.maximumf %31, %32 : vector<8x128xf32>
    %34 = tpu.concatenate %9, %17, %25, %33 in 1 : vector<8x128xf32>, vector<8x128xf32>, vector<8x128xf32>, vector<8x128xf32> -> vector<8x512xf32>
    %35 = arith.truncf %34 : vector<8x512xf32> to vector<8x512xbf16>
    %c0_19 = arith.constant 0 : index
    %c0_20 = arith.constant 0 : index
    %36 = vector.load %arg5[%c0_19, %c0_20] : memref<512x256xbf16, #tpu.memory_space<vmem>>, vector<512x256xbf16>
    %cst_21 = arith.constant dense<0.000000e+00> : vector<8x256xf32>
    %37 = tpu.matmul %35, %36, %cst_21 {dimension_numbers = #tpu.dot_dimension_numbers<[1], [0], [0], [1], [0, 0, 1, 1], [], []>} : vector<8x512xbf16>, vector<512x256xbf16>, vector<8x256xf32> -> vector<8x256xf32>
    %c0_22 = arith.constant 0 : index
    %c0_23 = arith.constant 0 : index
    %38 = vector.load %arg6[%c0_22, %c0_23] : memref<1x256xf32, #tpu.memory_space<vmem>>, vector<1x256xf32>
    %39 = vector.broadcast %38 : vector<1x256xf32> to vector<8x256xf32>
    %40 = arith.addf %37, %39 : vector<8x256xf32>
    %c0_24 = arith.constant 0 : index
    %c0_25 = arith.constant 0 : index
    %41 = vector.load %arg7[%c0_24, %c0_25] : memref<8x256xf32, #tpu.memory_space<vmem>>, vector<8x256xf32>
    tpu.vector_store %arg7[%c0_24, %c0_25], %40 {strides = array<i32>} : memref<8x256xf32, #tpu.memory_space<vmem>>, vector<8x256xf32>,
    return
  }
  func.func @transform_0(%arg0: i32) -> (i32, i32) {
    %c0_i32 = arith.constant 0 : i32
    %c0_i32_0 = arith.constant 0 : i32
    return %arg0, %c0_i32 : i32, i32
  }
  func.func @transform_1(%arg0: i32) -> (i32, i32) {
    %c0_i32 = arith.constant 0 : i32
    %c0_i32_0 = arith.constant 0 : i32
    %c0_i32_1 = arith.constant 0 : i32
    return %c0_i32, %c0_i32_0 : i32, i32
  }
  func.func @transform_2(%arg0: i32) -> (i32, i32) {
    %c0_i32 = arith.constant 0 : i32
    %c0_i32_0 = arith.constant 0 : i32
    %c0_i32_1 = arith.constant 0 : i32
    return %c0_i32, %c0_i32_0 : i32, i32
  }
  func.func @transform_3(%arg0: i32) -> (i32, i32, i32) {
    %c0_i32 = arith.constant 0 : i32
    %c0_i32_0 = arith.constant 0 : i32
    %c0_i32_1 = arith.constant 0 : i32
    %c0_i32_2 = arith.constant 0 : i32
    return %c0_i32, %c0_i32_0, %c0_i32_1 : i32, i32, i32
  }
  func.func @transform_4(%arg0: i32) -> (i32, i32) {
    %c0_i32 = arith.constant 0 : i32
    %c0_i32_0 = arith.constant 0 : i32
    %c0_i32_1 = arith.constant 0 : i32
    return %c0_i32, %c0_i32_0 : i32, i32
  }
  func.func @transform_5(%arg0: i32) -> (i32, i32) {
    %c0_i32 = arith.constant 0 : i32
    %c0_i32_0 = arith.constant 0 : i32
    %c0_i32_1 = arith.constant 0 : i32
    return %c0_i32, %c0_i32_0 : i32, i32
  }
  func.func @transform_6(%arg0: i32) -> (i32, i32) {
    %c0_i32 = arith.constant 0 : i32
    %c0_i32_0 = arith.constant 0 : i32
    return %arg0, %c0_i32 : i32, i32
  }
}

</mosaic_0001>

<bundles_post_ra>
// kernel: spinal_forward.1
= control target key start
LH: loop header
LB: loop body
LE: loop exit
PB: predicated region body
PF: predicated region fallthrough
CT: control target
= control target key end

     0   :  { %11 = vsyncpa [#allocation3], 0  ;;  %s2015_s0 = inlined_call_operand.hbm [shape: f32[8,128], index: 0, kind: input, shape index: {}]   ;;  %s2016_s1 = inlined_call_operand.hbm [shape: bf16[128,512], index: 1, kind: input, shape index: {}]   ;;  %s2017_s2 = inlined_call_operand.hbm [shape: f32[1,512], index: 2, kind: input, shape index: {}]   ;;  %s2018_s3 = inlined_call_operand.hbm [shape: bf16[3,128,128], index: 3, kind: input, shape index: {}]   ;;  %s2019_s4 = inlined_call_operand.hbm [shape: bf16[512,256], index: 4, kind: input, shape index: {}]   ;;  %s2020_s5 = inlined_call_operand.hbm [shape: f32[1,256], index: 5, kind: input, shape index: {}]   ;;  %s2021_s6 = inlined_call_operand.hbm [shape: f32[8,256], index: 6, kind: output, shape index: {}]  }
   0x1   :  { %12 = vsyncpa [#allocation6], 0 }
   0x2   :  { %13 = vsyncpa [#allocation9], 0 }
   0x3   :  { %14 = vsyncpa [#allocation12], 0  ;;  %s31_s23 = sshll.u32 %s2016_s1, 4  ;;  %s32_s23 = int_to_ptr.hbm [resolvable:$true] %s31_s23 }
   0x4   :  { %15 = vsyncpa [#allocation4], 0  ;;  %s1919_s24 = smov [#allocation5]   ;;  %s55_s28 = sshll.u32 %s2018_s3, 4  ;;  %s56_s28 = int_to_ptr.hbm [resolvable:$true] %s55_s28 }
   0x5   :  { %s33_s25 = sshll.u32 %s1919_s24, 4  ;;  %s1920_s29 = smov 256   ;;  %s34_s25 = int_to_ptr.vmem [resolvable:$true] %s33_s25 }
   0x6   :  { %s1921_s30 = smov 16   ;;  %s1922_s7 = smov [#allocation8]  }
   0x7   :  { %39 = dma.hbm_to_vmem [thread:$0]  %s32_s23, 4096, %s34_s25, [#allocation6], %s1920_s29, %s1920_s29, %s1921_s30  }
   0x8   :  { %s57_s8 = sshll.u32 %s1922_s7, 4  ;;  %s1923_s9 = smov 64   ;;  %s58_s8 = int_to_ptr.vmem [resolvable:$true] %s57_s8 }
   0x9   :  { %s1924_s10 = smov 4   ;;  %s21_s12 = sshll.u32 %s2015_s0, 4  ;;  %s22_s12 = int_to_ptr.hbm [resolvable:$true] %s21_s12 }
   0xa   :  { %63 = dma.hbm_to_vmem [thread:$0]  %s56_s28, 3072, %s58_s8, [#allocation9], %s1923_s9, %s1923_s9, %s1924_s10  }
   0xb   :  { %s1925_s13 = smov [#allocation2]   ;;  %s45_s16 = sshll.u32 %s2017_s2, 4  ;;  %s46_s16 = int_to_ptr.hbm [resolvable:$true] %s45_s16 }
   0xc   :  { %s23_s14 = sshll.u32 %s1925_s13, 4  ;;  %s1926_s17 = smov [#allocation7]   ;;  %s24_s14 = int_to_ptr.vmem [resolvable:$true] %s23_s14 }
   0xd   :  { %26 = dma.hbm_to_vmem [thread:$0]  %s22_s12, 128, %s24_s14, [#allocation3]  }
   0xe   :  { %s47_s18 = sshll.u32 %s1926_s17, 4  ;;  %s68_s21 = sshll.u32 %s2019_s4, 4  ;;  %s48_s18 = int_to_ptr.vmem [resolvable:$true] %s47_s18  ;;  %s69_s21 = int_to_ptr.hbm [resolvable:$true] %s68_s21 }
   0xf   :  { %50 = dma.hbm_to_vmem [thread:$0]  %s46_s16, 64, %s48_s18, [#allocation6]  }
  0x10   :  { %s1927_s0 = smov [#allocation10]   ;;  %s82_s25 = sshll.u32 %s2020_s5, 4  ;;  %s83_s25 = int_to_ptr.hbm [resolvable:$true] %s82_s25 }
  0x11   :  { %s70_s22 = sshll.u32 %s1927_s0, 4  ;;  %s1928_s26 = smov 128   ;;  %s71_s22 = int_to_ptr.vmem [resolvable:$true] %s70_s22 }
  0x12   :  { %s1929_s2 = smov 8   ;;  %s1930_s27 = smov [#allocation11]  }
  0x13   :  { %76 = dma.hbm_to_vmem [thread:$0]  %s69_s21, 8192, %s71_s22, [#allocation9], %s1928_s26, %s1928_s26, %s1929_s2  }
  0x14   :  { %s84_s28 = sshll.u32 %s1930_s27, 4  ;;  %s85_s28 = int_to_ptr.vmem [resolvable:$true] %s84_s28 }
  0x15   :  { %87 = dma.hbm_to_vmem [thread:$0]  %s83_s25, 32, %s85_s28, [#allocation12]  }
  0x16   :  { %1909 = dma.done.wait [#allocation3], 128  }
  0x17   :  { %1910 = vsyncadd [#allocation3], 4294967168 }
  0x18   :  { %1911 = dma.done.wait [#allocation6], 4160  }
  0x19   :  { %1912 = vsyncadd [#allocation6], 4294963136 }
  0x1a   :  { %1913 = dma.done.wait [#allocation9], 11264  }
  0x1b   :  { %1914 = vsyncadd [#allocation9], 4294956032 }
  0x1c   :  { %1915 = dma.done.wait [#allocation12], 32  }
  0x1d   :  { %1916 = vsyncadd [#allocation12], 4294967264  ;;  %v1242_v0 = vld [vmem:[#allocation5 + $0xe0] sm:$0xf]  ;;  %v1638_v1 = vld [vmem:[#allocation5 + $0xec] sm:$0xf0] }
  0x1e   :  { %v1226_v2 = vld [vmem:[#allocation5 + $0xc0] sm:$0xf]  ;;  %v1243_v3 = vor.u32 %v1638_v1, %v1242_v0  ;;  %v1634_v4 = vld [vmem:[#allocation5 + $0xcc] sm:$0xf0]  ;;  %v1637_v8 = vld [vmem:[#allocation5 + $0xec] sm:$0xf] }
  0x1f   :  { %v1227_v5 = vor.u32 %v1634_v4, %v1226_v2  ;;  %v1210_v6 = vld [vmem:[#allocation5 + $0xa0] sm:$0xf]  ;;  %v1630_v7 = vld [vmem:[#allocation5 + $0xac] sm:$0xf0]  ;;  %v1252_v9 = vld [vmem:[#allocation5 + $0xf8] sm:$0xf0] }
  0x20   :  { %316 = vmatpush.bf16.msra.mxu0 %v1243_v3  ;;  %v1633_v10 = vld [vmem:[#allocation5 + $0xcc] sm:$0xf]  ;;  %v1236_v11 = vld [vmem:[#allocation5 + $0xd8] sm:$0xf0]  ;;  %v1211_v12 = vor.u32 %v1630_v7, %v1210_v6  ;;  %v1255_v13 = vor.u32 %v1637_v8, %v1252_v9  ;;  %v1194_v14 = vld [vmem:[#allocation5 + $0x80] sm:$0xf] }
  0x21   :  { %v1626_v15 = vld [vmem:[#allocation5 + $0x8c] sm:$0xf0]  ;;  %v1239_v16 = vor.u32 %v1633_v10, %v1236_v11  ;;  %v1629_v17 = vld [vmem:[#allocation5 + $0xac] sm:$0xf]  ;;  %v1220_v18 = vld [vmem:[#allocation5 + $0xb8] sm:$0xf0] }
  0x22   :  { %355 = vmatpush.bf16.msra.mxu3 %v1255_v13  ;;  %v1195_v19 = vor.u32 %v1626_v15, %v1194_v14  ;;  %v1636_v20 = vld [vmem:[#allocation5 + $0xe4] sm:$0xf]  ;;  %v1178_v21 = vld [vmem:[#allocation5 + $0x60] sm:$0xf]  ;;  %v1622_v22 = vld [vmem:[#allocation5 + $0x6c] sm:$0xf0]  ;;  %v1223_v24 = vor.u32 %v1629_v17, %v1220_v18 }
  0x23   :  { %v1244_v23 = vld [vmem:[#allocation5 + $0xf0] sm:$0xf0]  ;;  %v1632_v26 = vld [vmem:[#allocation5 + $0xc4] sm:$0xf]  ;;  %v1625_v28 = vld [vmem:[#allocation5 + $0x8c] sm:$0xf]  ;;  %v1179_v30 = vor.u32 %v1622_v22, %v1178_v21 }
  0x24   :  { %317 = vmatpush.bf16.msra.mxu0 %v1227_v5  ;;  %v1247_v25 = vor.u32 %v1636_v20, %v1244_v23  ;;  %v1228_v27 = vld [vmem:[#allocation5 + $0xd0] sm:$0xf0]  ;;  %v1204_v29 = vld [vmem:[#allocation5 + $0x98] sm:$0xf0]  ;;  %v1162_v31 = vld [vmem:[#allocation5 + $0x40] sm:$0xf] }
  0x25   :  { %v1231_v32 = vor.u32 %v1632_v26, %v1228_v27  ;;  %v1618_v33 = vld [vmem:[#allocation5 + $0x4c] sm:$0xf0]  ;;  %v1628_v34 = vld [vmem:[#allocation5 + $0xa4] sm:$0xf]  ;;  %v1212_v35 = vld [vmem:[#allocation5 + $0xb0] sm:$0xf0]  ;;  %v1207_v36 = vor.u32 %v1625_v28, %v1204_v29 }
  0x26   :  { %356 = vmatpush.bf16.msra.mxu3 %v1239_v16  ;;  %329 = vmatpush.bf16.msra.mxu1 %v1247_v25  ;;  %v1621_v37 = vld [vmem:[#allocation5 + $0x6c] sm:$0xf]  ;;  %v1188_v38 = vld [vmem:[#allocation5 + $0x78] sm:$0xf0]  ;;  %v1163_v39 = vor.u32 %v1618_v33, %v1162_v31  ;;  %v1146_v40 = vld [vmem:[#allocation5 + $0x20] sm:$0xf]  ;;  %v1215_v41 = vor.u32 %v1628_v34, %v1212_v35 }
  0x27   :  { %v1614_v42 = vld [vmem:[#allocation5 + $0x2c] sm:$0xf0]  ;;  %v1624_v43 = vld [vmem:[#allocation5 + $0x84] sm:$0xf]  ;;  %v1196_v44 = vld [vmem:[#allocation5 + $0x90] sm:$0xf0]  ;;  %v1191_v45 = vor.u32 %v1621_v37, %v1188_v38 }
  0x28   :  { %318 = vmatpush.bf16.msra.mxu0 %v1211_v12  ;;  %v1617_v46 = vld [vmem:[#allocation5 + $0x4c] sm:$0xf]  ;;  %v1172_v47 = vld [vmem:[#allocation5 + $0x58] sm:$0xf0]  ;;  %v1147_v48 = vor.u32 %v1614_v42, %v1146_v40  ;;  %v1130_v49 = vld [vmem:[#allocation5] sm:$0xf]  ;;  %v1199_v50 = vor.u32 %v1624_v43, %v1196_v44 }
  0x29   :  { %v1610_v51 = vld [vmem:[#allocation5 + $0xc] sm:$0xf0]  ;;  %v1620_v52 = vld [vmem:[#allocation5 + $0x64] sm:$0xf]  ;;  %v1180_v53 = vld [vmem:[#allocation5 + $0x70] sm:$0xf0]  ;;  %v1175_v54 = vor.u32 %v1617_v46, %v1172_v47 }
  0x2a   :  { %357 = vmatpush.bf16.msra.mxu3 %v1223_v24  ;;  %330 = vmatpush.bf16.msra.mxu1 %v1231_v32  ;;  %v1613_v55 = vld [vmem:[#allocation5 + $0x2c] sm:$0xf]  ;;  %v1156_v56 = vld [vmem:[#allocation5 + $0x38] sm:$0xf0]  ;;  %v1131_v57 = vor.u32 %v1610_v51, %v1130_v49  ;;  %v1183_v59 = vor.u32 %v1620_v52, %v1180_v53  ;;  %v1616_v61 = vld [vmem:[#allocation5 + $0x44] sm:$0xf] }
  0x2b   :  { %v112_v58 = vld [vmem:[#allocation2] sm:$0xff]  ;;  %v1164_v62 = vld [vmem:[#allocation5 + $0x50] sm:$0xf0]  ;;  %v1159_v63 = vor.u32 %v1613_v55, %v1156_v56  ;;  %v1609_v1 = vld [vmem:[#allocation5 + $0xc] sm:$0xf]  ;;  %s1931_s4 = smov [#allocation13]  }
  0x2c   :  { %319 = vmatpush.bf16.msra.mxu0 %v1195_v19  ;;  %v1647_v60 = vld [vmem:[#allocation8 + $0x38] sm:$0xff]  ;;  %v1985_v0 = vpack.c.bf16 %v112_v58, %v112_v58  ;;  %v1410_v3 = vld [vmem:[#allocation10 + $0x70] sm:$0xf]  ;;  %v1167_v5 = vor.u32 %v1616_v61, %v1164_v62  ;;  %v1612_v7 = vld [vmem:[#allocation5 + $0x24] sm:$0xf]  ;;  %s1113_s5 = sshll.u32 %s1931_s4, 4  ;;  %s1114_s5 = int_to_ptr.vmem [resolvable:$true] %s1113_s5 }
  0x2d   :  { %v1140_v2 = vld [vmem:[#allocation5 + $0x18] sm:$0xf0]  ;;  %v1646_v6 = vld [vmem:[#allocation8 + $0x30] sm:$0xff]  ;;  %v1402_v11 = vld [vmem:[#allocation10 + $0x60] sm:$0xf]  ;;  %s1115_s7 = sshll.u32 %s2021_s6, 4  ;;  %s1116_s7 = int_to_ptr.hbm [resolvable:$true] %s1115_s7 }
  0x2e   :  { %358 = vmatpush.bf16.msra.mxu3 %v1207_v36  ;;  %331 = vmatpush.bf16.msra.mxu1 %v1215_v41  ;;  %v1679_v4 = vld [vmem:[#allocation10 + $0x74] sm:$0xf0]  ;;  %v1148_v8 = vld [vmem:[#allocation5 + $0x30] sm:$0xf0]  ;;  %v1143_v9 = vor.u32 %v1609_v1, %v1140_v2  ;;  %v1677_v12 = vld [vmem:[#allocation10 + $0x64] sm:$0xf0] }
  0x2f   :  { %v1411_v10 = vor.u32 %v1679_v4, %v1410_v3  ;;  %v1151_v13 = vor.u32 %v1612_v7, %v1148_v8  ;;  %v1645_v14 = vld [vmem:[#allocation8 + $0x28] sm:$0xff]  ;;  %v1608_v15 = vld [vmem:[#allocation5 + $0x4] sm:$0xf]  ;;  %v1132_v16 = vld [vmem:[#allocation5 + $0x10] sm:$0xf0]  ;;  %v1403_v17 = vor.u32 %v1677_v12, %v1402_v11 }
  0x30   :  { %320 = vmatpush.bf16.msra.mxu0 %v1179_v30  ;;  %v1394_v18 = vld [vmem:[#allocation10 + $0x50] sm:$0xf]  ;;  %v1675_v19 = vld [vmem:[#allocation10 + $0x54] sm:$0xf0]  ;;  %v1135_v20 = vor.u32 %v1608_v15, %v1132_v16  ;;  %v1644_v21 = vld [vmem:[#allocation8 + $0x20] sm:$0xff] }
  0x31   :  { %v1395_v22 = vor.u32 %v1675_v19, %v1394_v18  ;;  %v1386_v23 = vld [vmem:[#allocation10 + $0x40] sm:$0xf]  ;;  %v1673_v24 = vld [vmem:[#allocation10 + $0x44] sm:$0xf0]  ;;  %v1643_v25 = vld [vmem:[#allocation8 + $0x18] sm:$0xff] }
  0x32   :  { %359 = vmatpush.bf16.msra.mxu3 %v1191_v45  ;;  %332 = vmatpush.bf16.msra.mxu1 %v1199_v50  ;;  %v1387_v26 = vor.u32 %v1673_v24, %v1386_v23  ;;  %v1378_v27 = vld [vmem:[#allocation10 + $0x30] sm:$0xf]  ;;  %v1671_v28 = vld [vmem:[#allocation10 + $0x34] sm:$0xf0]  ;;  %v1370_v31 = vld [vmem:[#allocation10 + $0x20] sm:$0xf] }
  0x33   :  { %v1642_v29 = vld [vmem:[#allocation8 + $0x10] sm:$0xff]  ;;  %v1379_v30 = vor.u32 %v1671_v28, %v1378_v27  ;;  %v1669_v32 = vld [vmem:[#allocation10 + $0x24] sm:$0xf0]  ;;  %v1667_v35 = vld [vmem:[#allocation10 + $0x14] sm:$0xf0] }
  0x34   :  { %321 = vmatpush.bf16.msra.mxu0 %v1163_v39  ;;  %v1371_v33 = vor.u32 %v1669_v32, %v1370_v31  ;;  %v1362_v34 = vld [vmem:[#allocation10 + $0x10] sm:$0xf]  ;;  %v1354_v37 = vld [vmem:[#allocation10] sm:$0xf]  ;;  %v1665_v38 = vld [vmem:[#allocation10 + $0x4] sm:$0xf0] }
  0x35   :  { %v1363_v36 = vor.u32 %v1667_v35, %v1362_v34  ;;  %v1678_v39 = vld [vmem:[#allocation10 + $0x74] sm:$0xf]  ;;  %v1412_v40 = vld [vmem:[#allocation10 + $0x78] sm:$0xf0]  ;;  %v1355_v41 = vor.u32 %v1665_v38, %v1354_v37  ;;  %v1676_v43 = vld [vmem:[#allocation10 + $0x64] sm:$0xf] }
  0x36   :  { %360 = vmatpush.bf16.msra.mxu3 %v1175_v54  ;;  %333 = vmatpush.bf16.msra.mxu1 %v1183_v59  ;;  %v1415_v42 = vor.u32 %v1678_v39, %v1412_v40  ;;  %v1404_v44 = vld [vmem:[#allocation10 + $0x68] sm:$0xf0]  ;;  %v1674_v46 = vld [vmem:[#allocation10 + $0x54] sm:$0xf]  ;;  %v1396_v47 = vld [vmem:[#allocation10 + $0x58] sm:$0xf0] }
  0x37   :  { %v1407_v45 = vor.u32 %v1676_v43, %v1404_v44  ;;  %v1399_v49 = vor.u32 %v1674_v46, %v1396_v47  ;;  %v1672_v50 = vld [vmem:[#allocation10 + $0x44] sm:$0xf]  ;;  %v1388_v51 = vld [vmem:[#allocation10 + $0x48] sm:$0xf0]  ;;  %v1670_v54 = vld [vmem:[#allocation10 + $0x34] sm:$0xf] }
  0x38   :  { %322 = vmatpush.bf16.msra.mxu0 %v1147_v48  ;;  %v1641_v48 = vld [vmem:[#allocation8 + $0x8] sm:$0xff]  ;;  %v1640_v52 = vld [vmem:[#allocation8] sm:$0xff]  ;;  %v1391_v53 = vor.u32 %v1672_v50, %v1388_v51  ;;  %v1380_v55 = vld [vmem:[#allocation10 + $0x38] sm:$0xf0] }
  0x39   :  { %v1383_v56 = vor.u32 %v1670_v54, %v1380_v55  ;;  %v1372_v58 = vld [vmem:[#allocation10 + $0x28] sm:$0xf0]  ;;  %v1364_v61 = vld [vmem:[#allocation10 + $0x18] sm:$0xf0]  ;;  %v1250_v3 = vld [vmem:[#allocation5 + $0xe8] sm:$0xf] }
  0x3a   :  { %361 = vmatpush.bf16.msra.mxu3 %v1159_v63  ;;  %334 = vmatpush.bf16.msra.mxu1 %v1167_v5  ;;  %v1664_v63 = vld [vmem:[#allocation10 + $0x4] sm:$0xf]  ;;  %v1356_v1 = vld [vmem:[#allocation10 + $0x8] sm:$0xf0]  ;;  %v1639_v4 = vld [vmem:[#allocation5 + $0xf4] sm:$0xf0] }
  0x3b   :  { %v1359_v2 = vor.u32 %v1664_v63, %v1356_v1  ;;  %v1474_v5 = vld [vmem:[#allocation10 + $0xf0] sm:$0xf]  ;;  %v1695_v7 = vld [vmem:[#allocation10 + $0xf4] sm:$0xf0]  ;;  %v1234_v8 = vld [vmem:[#allocation5 + $0xc8] sm:$0xf] }
  0x3c   :  { %323 = vmatpush.bf16.msra.mxu0 %v1131_v57  ;;  %v1668_v57 = vld [vmem:[#allocation10 + $0x24] sm:$0xf]  ;;  %v1466_v11 = vld [vmem:[#allocation10 + $0xe0] sm:$0xf]  ;;  %v1693_v12 = vld [vmem:[#allocation10 + $0xe4] sm:$0xf0] }
  0x3d   :  { %v1375_v59 = vor.u32 %v1668_v57, %v1372_v58  ;;  %v1467_v15 = vor.u32 %v1693_v12, %v1466_v11  ;;  %v1218_v16 = vld [vmem:[#allocation5 + $0xa8] sm:$0xf]  ;;  %v1458_v18 = vld [vmem:[#allocation10 + $0xd0] sm:$0xf]  ;;  %v1691_v19 = vld [vmem:[#allocation10 + $0xd4] sm:$0xf0] }
  0x3e   :  { %362 = vmatpush.bf16.msra.mxu3 %v1143_v9  ;;  %335 = vmatpush.bf16.msra.mxu1 %v1151_v13  ;;  %v1635_v9 = vld [vmem:[#allocation5 + $0xd4] sm:$0xf0]  ;;  %v1990_v13 = vld [vmem:[#allocation7] sm:$0xf]  ;;  %v1459_v23 = vor.u32 %v1691_v19, %v1458_v18  ;;  %v1202_v24 = vld [vmem:[#allocation5 + $0x88] sm:$0xf] }
  0x3f   :  { %324 = vmatmul.bf16.vlgmr.msra.gmra.mxu0 %v1985_v0  ;;  %v1623_v34 = vld [vmem:[#allocation5 + $0x74] sm:$0xf0]  ;;  %v1442_v38 = vld [vmem:[#allocation10 + $0xb0] sm:$0xf]  ;;  %v1687_v39 = vld [vmem:[#allocation10 + $0xb4] sm:$0xf0] }
  0x40   :  { %434 = vmatpush.bf16.msrb.mxu0 %v1647_v60  ;;  %v1666_v60 = vld [vmem:[#allocation10 + $0x14] sm:$0xf]  ;;  %v1443_v44 = vor.u32 %v1687_v39, %v1442_v38  ;;  %v1434_v46 = vld [vmem:[#allocation10 + $0xa0] sm:$0xf]  ;;  %v1685_v47 = vld [vmem:[#allocation10 + $0xa4] sm:$0xf0] }
  0x41   :  { %363 = vmatmul.bf16.vlgmr.msra.gmra.mxu3 %v1985_v0  ;;  %v1367_v62 = vor.u32 %v1666_v60, %v1364_v61  ;;  %v1615_v50 = vld [vmem:[#allocation5 + $0x34] sm:$0xf0]  ;;  %v1435_v51 = vor.u32 %v1685_v47, %v1434_v46  ;;  %v1651_v54 = vld [vmem:[#allocation8 + $0x58] sm:$0xff]  ;;  %v1426_v55 = vld [vmem:[#allocation10 + $0x90] sm:$0xf] }
  0x42   :  { %1002 = vmatpush.bf16.msrb.mxu3 %v1411_v10  ;;  %336 = vmatpush.bf16.msra.mxu1 %v1135_v20  ;;  %v1475_v10 = vor.u32 %v1695_v7, %v1474_v5  ;;  %v148_v20 = vperm.slane %v1990_v13, 0  ;;  %v1138_v58 = vld [vmem:[#allocation5 + $0x8] sm:$0xf]  ;;  %v1650_v61 = vld [vmem:[#allocation8 + $0x50] sm:$0xff]  ;;  %v1681_v63 = vld [vmem:[#allocation10 + $0x84] sm:$0xf0] }
  0x43   :  { %v1690_v11 = vld [vmem:[#allocation10 + $0xd4] sm:$0xf]  ;;  %v1460_v12 = vld [vmem:[#allocation10 + $0xd8] sm:$0xf0]  ;;  %v1648_v18 = vld [vmem:[#allocation8 + $0x40] sm:$0xff] }
  0x44   :  { %435 = vmatpush.bf16.msrb.mxu0 %v1646_v6  ;;  %v1251_v6 = vor.u32 %v1639_v4, %v1250_v3  ;;  %v1476_v3 = vld [vmem:[#allocation10 + $0xf8] sm:$0xf0] }
  0x45   :  { %337 = vmatmul.bf16.vlgmr.msra.gmra.mxu1 %v1985_v0  ;;  %v1663_v39 = vld [vmem:[#allocation8 + $0xb8] sm:$0xff] }
  0x46   :  { %1003 = vmatpush.bf16.msrb.mxu3 %v1403_v17  ;;  %342 = vmatpush.bf16.msra.mxu2 %v1251_v6  ;;  %v1631_v17 = vld [vmem:[#allocation5 + $0xb4] sm:$0xf0] }
  0x48   :  { %436 = vmatpush.bf16.msrb.mxu0 %v1645_v14  ;;  %v1235_v14 = vor.u32 %v1635_v9, %v1234_v8  ;;  %v1692_v8 = vld [vmem:[#allocation10 + $0xe4] sm:$0xf]  ;;  %v1468_v9 = vld [vmem:[#allocation10 + $0xe8] sm:$0xf0] }
  0x4a   :  { %1004 = vmatpush.bf16.msrb.mxu3 %v1395_v22  ;;  %343 = vmatpush.bf16.msra.mxu2 %v1235_v14  ;;  %v1219_v22 = vor.u32 %v1631_v17, %v1218_v16  ;;  %v1649_v14 = vld [vmem:[#allocation8 + $0x48] sm:$0xff]  ;;  %v1688_v16 = vld [vmem:[#allocation10 + $0xc4] sm:$0xf] }
  0x4b   :  { %v1452_v17 = vld [vmem:[#allocation10 + $0xc8] sm:$0xf0] }
  0x4c   :  { %437 = vmatpush.bf16.msrb.mxu0 %v1644_v21  ;;  %v1655_v21 = vld [vmem:[#allocation8 + $0x78] sm:$0xff]  ;;  %v1455_v19 = vor.u32 %v1688_v16, %v1452_v17 }
  0x4d   :  { %515 = vmatpush.bf16.msrb.mxu1 %v1655_v21  ;;  %v1444_v21 = vld [vmem:[#allocation10 + $0xb8] sm:$0xf0] }
  0x4e   :  { %1005 = vmatpush.bf16.msrb.mxu3 %v1387_v26  ;;  %v1654_v26 = vld [vmem:[#allocation8 + $0x70] sm:$0xff]  ;;  %344 = vmatpush.bf16.msra.mxu2 %v1219_v22 }
  0x50   :  { %438 = vmatpush.bf16.msrb.mxu0 %v1643_v25  ;;  %v1627_v25 = vld [vmem:[#allocation5 + $0x94] sm:$0xf0] }
  0x51   :  { %v1203_v31 = vor.u32 %v1627_v25, %v1202_v24  ;;  %516 = vmatpush.bf16.msrb.mxu1 %v1654_v26  ;;  %v1682_v25 = vld [vmem:[#allocation10 + $0x94] sm:$0xf]  ;;  %v1428_v26 = vld [vmem:[#allocation10 + $0x98] sm:$0xf0] }
  0x52   :  { %1006 = vmatpush.bf16.msrb.mxu3 %v1379_v30  ;;  %v1689_v30 = vld [vmem:[#allocation10 + $0xc4] sm:$0xf0] }
  0x53   :  { %345 = vmatpush.bf16.msra.mxu2 %v1203_v31  ;;  %v149_v31 = vperm.slane %v1990_v13, 1 }
  0x54   :  { %439 = vmatpush.bf16.msrb.mxu0 %v1642_v29  ;;  %v1450_v29 = vld [vmem:[#allocation10 + $0xc0] sm:$0xf] }
  0x55   :  { %v1451_v35 = vor.u32 %v1689_v30, %v1450_v29  ;;  %v1420_v29 = vld [vmem:[#allocation10 + $0x88] sm:$0xf0] }
  0x56   :  { %1007 = vmatpush.bf16.msrb.mxu3 %v1371_v33  ;;  %v1186_v33 = vld [vmem:[#allocation5 + $0x68] sm:$0xf] }
  0x57   :  { %v1187_v40 = vor.u32 %v1623_v34, %v1186_v33  ;;  %v1538_v33 = vld [vmem:[#allocation10 + $0x170] sm:$0xf]  ;;  %v1711_v34 = vld [vmem:[#allocation10 + $0x174] sm:$0xf0] }
  0x58   :  { %440 = vmatpush.bf16.msrb.mxu0 %v1641_v48 }
  0x59   :  { %346 = vmatpush.bf16.msra.mxu2 %v1187_v40 }
  0x5a   :  { %1008 = vmatpush.bf16.msrb.mxu3 %v1363_v36  ;;  %v1653_v36 = vld [vmem:[#allocation8 + $0x68] sm:$0xff] }
  0x5b   :  { %517 = vmatpush.bf16.msrb.mxu1 %v1653_v36  ;;  %v1539_v36 = vor.u32 %v1711_v34, %v1538_v33  ;;  %v1492_v33 = vld [vmem:[#allocation10 + $0x118] sm:$0xf0] }
  0x5c   :  { %441 = vmatpush.bf16.msrb.mxu0 %v1640_v52 }
  0x5e   :  { %1009 = vmatpush.bf16.msrb.mxu3 %v1355_v41  ;;  %v1170_v41 = vld [vmem:[#allocation5 + $0x48] sm:$0xf] }
  0x60   :  { %1015 = vmatpush.bf16.msra.mxu0 %v1475_v10  ;;  %v1471_v10 = vor.u32 %v1692_v8, %v1468_v9  ;;  %v1710_v8 = vld [vmem:[#allocation10 + $0x174] sm:$0xf]  ;;  %v1540_v9 = vld [vmem:[#allocation10 + $0x178] sm:$0xf0] }
  0x62   :  { %1054 = vmatpush.bf16.msra.mxu3 %v1415_v42  ;;  %v1619_v42 = vld [vmem:[#allocation5 + $0x54] sm:$0xf0] }
  0x63   :  { %v1171_v48 = vor.u32 %v1619_v42, %v1170_v41  ;;  %v1522_v42 = vld [vmem:[#allocation10 + $0x150] sm:$0xf] }
  0x64   :  { %1016 = vmatpush.bf16.msra.mxu0 %v1467_v15  ;;  %v1463_v15 = vor.u32 %v1690_v11, %v1460_v12  ;;  %v1543_v12 = vor.u32 %v1710_v8, %v1540_v9  ;;  %v1554_v9 = vld [vmem:[#allocation10 + $0x190] sm:$0xf] }
  0x65   :  { %347 = vmatpush.bf16.msra.mxu2 %v1171_v48 }
  0x66   :  { %1055 = vmatpush.bf16.msra.mxu3 %v1407_v45  ;;  %v1652_v45 = vld [vmem:[#allocation8 + $0x60] sm:$0xff] }
  0x67   :  { %518 = vmatpush.bf16.msrb.mxu1 %v1652_v45 }
  0x68   :  { %1017 = vmatpush.bf16.msra.mxu0 %v1459_v23  ;;  %v1436_v23 = vld [vmem:[#allocation10 + $0xa8] sm:$0xf0] }
  0x6a   :  { %1056 = vmatpush.bf16.msra.mxu3 %v1399_v49  ;;  %v1154_v49 = vld [vmem:[#allocation5 + $0x28] sm:$0xf] }
  0x6b   :  { %v1155_v57 = vor.u32 %v1615_v50, %v1154_v49  ;;  %519 = vmatpush.bf16.msrb.mxu1 %v1651_v54  ;;  %v1514_v49 = vld [vmem:[#allocation10 + $0x140] sm:$0xf]  ;;  %v1705_v50 = vld [vmem:[#allocation10 + $0x144] sm:$0xf0] }
  0x6c   :  { %1018 = vmatpush.bf16.msra.mxu0 %v1451_v35  ;;  %v1530_v35 = vld [vmem:[#allocation10 + $0x160] sm:$0xf]  ;;  %v1515_v54 = vor.u32 %v1705_v50, %v1514_v49  ;;  %v1723_v49 = vld [vmem:[#allocation10 + $0x1d4] sm:$0xf0] }
  0x6d   :  { %348 = vmatpush.bf16.msra.mxu2 %v1155_v57  ;;  %v1660_v57 = vld [vmem:[#allocation8 + $0xa0] sm:$0xff] }
  0x6e   :  { %1057 = vmatpush.bf16.msra.mxu3 %v1391_v53 }
  0x6f   :  { %520 = vmatpush.bf16.msrb.mxu1 %v1650_v61  ;;  %v1701_v61 = vld [vmem:[#allocation10 + $0x124] sm:$0xf0] }
  0x70   :  { %1019 = vmatpush.bf16.msra.mxu0 %v1443_v44  ;;  %v1662_v44 = vld [vmem:[#allocation8 + $0xb0] sm:$0xff] }
  0x72   :  { %1058 = vmatpush.bf16.msra.mxu3 %v1383_v56  ;;  %v1683_v56 = vld [vmem:[#allocation10 + $0x94] sm:$0xf0] }
  0x73   :  { %v1427_v60 = vor.u32 %v1683_v56, %v1426_v55  ;;  %521 = vmatpush.bf16.msrb.mxu1 %v1649_v14  ;;  %v1506_v55 = vld [vmem:[#allocation10 + $0x130] sm:$0xf]  ;;  %v1703_v56 = vld [vmem:[#allocation10 + $0x134] sm:$0xf0]  ;;  %v1708_v14 = vld [vmem:[#allocation10 + $0x164] sm:$0xf] }
  0x74   :  { %1020 = vmatpush.bf16.msra.mxu0 %v1435_v51  ;;  %v1661_v51 = vld [vmem:[#allocation8 + $0xa8] sm:$0xff] }
  0x76   :  { %1059 = vmatpush.bf16.msra.mxu3 %v1375_v59  ;;  %v1611_v59 = vld [vmem:[#allocation5 + $0x14] sm:$0xf0] }
  0x77   :  { %v1139_v1 = vor.u32 %v1611_v59, %v1138_v58  ;;  %522 = vmatpush.bf16.msrb.mxu1 %v1648_v18  ;;  %v1507_v58 = vor.u32 %v1703_v56, %v1506_v55 }
  0x78   :  { %1021 = vmatpush.bf16.msra.mxu0 %v1427_v60  ;;  %v1498_v60 = vld [vmem:[#allocation10 + $0x120] sm:$0xf] }
  0x79   :  { %349 = vmatpush.bf16.msra.mxu2 %v1139_v1  ;;  %v1490_v1 = vld [vmem:[#allocation10 + $0x110] sm:$0xf] }
  0x7a   :  { %1060 = vmatpush.bf16.msra.mxu3 %v1367_v62  ;;  %v1418_v62 = vld [vmem:[#allocation10 + $0x80] sm:$0xf] }
  0x7b   :  { %v1419_v4 = vor.u32 %v1681_v63, %v1418_v62  ;;  %1028 = vmatpush.bf16.msra.mxu1 %v1539_v36  ;;  %v1659_v62 = vld [vmem:[#allocation8 + $0x98] sm:$0xff]  ;;  %v1499_v63 = vor.u32 %v1701_v61, %v1498_v60  ;;  %v1484_v36 = vld [vmem:[#allocation10 + $0x108] sm:$0xf0] }
  0x7c   :  { %350 = vmatmul.bf16.vlgmr.msra.gmra.mxu2 %v1985_v0  ;;  %v1684_v0 = vld [vmem:[#allocation10 + $0xa4] sm:$0xf] }
  0x7d   :  { %1022 = vmatpush.bf16.msra.mxu0 %v1419_v4  ;;  %v1439_v24 = vor.u32 %v1684_v0, %v1436_v23  ;;  %596 = vmatpush.bf16.msrb.mxu2 %v1663_v39  ;;  %v1704_v0 = vld [vmem:[#allocation10 + $0x144] sm:$0xf]  ;;  %v1516_v23 = vld [vmem:[#allocation10 + $0x148] sm:$0xf0]  ;;  %v1602_v39 = vld [vmem:[#allocation10 + $0x1f0] sm:$0xf] }
  0x7e   :  { %1061 = vmatpush.bf16.msra.mxu3 %v1359_v2  ;;  %v1694_v2 = vld [vmem:[#allocation10 + $0xf4] sm:$0xf] }
  0x7f   :  { %v1479_v7 = vor.u32 %v1694_v2, %v1476_v3  ;;  %v1699_v2 = vld [vmem:[#allocation10 + $0x114] sm:$0xf0]  ;;  %v1658_v3 = vld [vmem:[#allocation8 + $0x90] sm:$0xff] }
  0x80   :  { %v1491_v4 = vor.u32 %v1699_v2, %v1490_v1  ;;  %v1719_v1 = vld [vmem:[#allocation10 + $0x1b4] sm:$0xf0] }
  0x81   :  { %597 = vmatpush.bf16.msrb.mxu2 %v1662_v44  ;;  %v1725_v44 = vld [vmem:[#allocation10 + $0x1e4] sm:$0xf0] }
  0x85   :  { %598 = vmatpush.bf16.msrb.mxu2 %v1661_v51 }
  0x89   :  { %599 = vmatpush.bf16.msrb.mxu2 %v1660_v57 }
  0x8d   :  { %600 = vmatpush.bf16.msrb.mxu2 %v1659_v62 }
  0x91   :  { %601 = vmatpush.bf16.msrb.mxu2 %v1658_v3 }
  0xbc   :  { %v325_v27 = vpop.f32.mrf.mxu0 }
  0xbd   :  { %v326_v28 = vadd.f32 %v325_v27, %v148_v20  ;;  %v1686_v20 = vld [vmem:[#allocation10 + $0xb4] sm:$0xf]  ;;  %v1431_v27 = vor.u32 %v1682_v25, %v1428_v26  ;;  %v1519_v25 = vor.u32 %v1704_v0, %v1516_v23  ;;  %v1724_v0 = vld [vmem:[#allocation10 + $0x1e4] sm:$0xf]  ;;  %v1596_v23 = vld [vmem:[#allocation10 + $0x1e8] sm:$0xf0] }
  0xbe   :  { %v1447_v22 = vor.u32 %v1686_v20, %v1444_v21  ;;  %v1524_v20 = vld [vmem:[#allocation10 + $0x158] sm:$0xf0]  ;;  %v1657_v21 = vld [vmem:[#allocation8 + $0x88] sm:$0xff]  ;;  %v1702_v26 = vld [vmem:[#allocation10 + $0x134] sm:$0xf] }
  0xbf   :  { %v368_v32 = vmax.f32 %v326_v28, 0.0  ;;  %v1680_v28 = vld [vmem:[#allocation10 + $0x84] sm:$0xf]  ;;  %602 = vmatpush.bf16.msrb.mxu2 %v1657_v21 }
  0xc0   :  { %v1423_v30 = vor.u32 %v1680_v28, %v1420_v29  ;;  %v1700_v29 = vld [vmem:[#allocation10 + $0x124] sm:$0xf] }
  0xc1   :  { %v369_v37 = vpack.c.bf16 %v368_v32, %v368_v32 }
  0xc2   :  { %v1993_v52 = vpop.f32.mrf.mxu1 }
  0xc3   :  { %442 = vmatmul.bf16.vlgmr.msrb.gmra.mxu0 %v369_v37  ;;  %1010 = vmatmul.bf16.vlgmr.msrb.gmra.mxu3 %v369_v37  ;;  %v339_v32 = vadd.f32 %v1993_v52, %v149_v31 }
  0xc4   :  { %v327_v43 = vpop.f32.mrf.mxu0  ;;  %v1995_v53 = vpop.f32.mrf.mxu3  ;;  %1067 = vmatpush.bf16.msrb.mxu0 %v1479_v7  ;;  %v1697_v7 = vld [vmem:[#allocation10 + $0x104] sm:$0xf0] }
  0xc5   :  { %v1707_v43 = vld [vmem:[#allocation10 + $0x154] sm:$0xf0] }
  0xc6   :  { %v1523_v47 = vor.u32 %v1707_v43, %v1522_v42  ;;  %v150_v42 = vperm.slane %v1990_v13, 2 }
  0xc8   :  { %1068 = vmatpush.bf16.msrb.mxu0 %v1471_v10 }
  0xca   :  { %v340_v5 = vpop.f32.mrf.mxu1 }
  0xcc   :  { %v366_v6 = vpop.f32.mrf.mxu3  ;;  %1069 = vmatpush.bf16.msrb.mxu0 %v1463_v15  ;;  %v1532_v15 = vld [vmem:[#allocation10 + $0x168] sm:$0xf0] }
  0xcd   :  { %v1482_v6 = vld [vmem:[#allocation10 + $0x100] sm:$0xf]  ;;  %v1535_v17 = vor.u32 %v1708_v14, %v1532_v15 }
  0xce   :  { %v1483_v11 = vor.u32 %v1697_v7, %v1482_v6  ;;  %v1717_v6 = vld [vmem:[#allocation10 + $0x1a4] sm:$0xf0] }
  0xd0   :  { %1070 = vmatpush.bf16.msrb.mxu0 %v1455_v19  ;;  %v1706_v19 = vld [vmem:[#allocation10 + $0x154] sm:$0xf] }
  0xd3   :  { %1062 = vmatmul.bf16.vlgmr.msra.gmra.mxu3 %v369_v37  ;;  %v1709_v37 = vld [vmem:[#allocation10 + $0x164] sm:$0xf0] }
  0xd4   :  { %1071 = vmatpush.bf16.msrb.mxu0 %v1447_v22  ;;  %v1531_v41 = vor.u32 %v1709_v37, %v1530_v35  ;;  %v1527_v22 = vor.u32 %v1706_v19, %v1524_v20  ;;  %v1696_v35 = vld [vmem:[#allocation10 + $0x104] sm:$0xf]  ;;  %v1604_v19 = vld [vmem:[#allocation10 + $0x1f8] sm:$0xf0] }
  0xd5   :  { %v1487_v37 = vor.u32 %v1696_v35, %v1484_v36  ;;  %v1714_v36 = vld [vmem:[#allocation10 + $0x194] sm:$0xf] }
  0xd6   :  { %1029 = vmatpush.bf16.msra.mxu1 %v1531_v41  ;;  %v1594_v41 = vld [vmem:[#allocation10 + $0x1e0] sm:$0xf] }
  0xd8   :  { %1072 = vmatpush.bf16.msrb.mxu0 %v1439_v24  ;;  %v1656_v24 = vld [vmem:[#allocation8 + $0x80] sm:$0xff] }
  0xd9   :  { %603 = vmatpush.bf16.msrb.mxu2 %v1656_v24  ;;  %v1599_v24 = vor.u32 %v1724_v0, %v1596_v23 }
  0xda   :  { %1030 = vmatpush.bf16.msra.mxu1 %v1523_v47  ;;  %v1586_v47 = vld [vmem:[#allocation10 + $0x1d0] sm:$0xf] }
  0xdc   :  { %1073 = vmatpush.bf16.msrb.mxu0 %v1431_v27  ;;  %v1508_v27 = vld [vmem:[#allocation10 + $0x138] sm:$0xf0] }
  0xdd   :  { %v1511_v28 = vor.u32 %v1702_v26, %v1508_v27  ;;  %v1720_v27 = vld [vmem:[#allocation10 + $0x1c4] sm:$0xf] }
  0xde   :  { %1031 = vmatpush.bf16.msra.mxu1 %v1515_v54 }
  0xe0   :  { %1074 = vmatpush.bf16.msrb.mxu0 %v1423_v30  ;;  %v1500_v30 = vld [vmem:[#allocation10 + $0x128] sm:$0xf0] }
  0xe1   :  { %v1503_v31 = vor.u32 %v1700_v29, %v1500_v30  ;;  %v1718_v30 = vld [vmem:[#allocation10 + $0x1b4] sm:$0xf] }
  0xe2   :  { %1032 = vmatpush.bf16.msra.mxu1 %v1507_v58  ;;  %v1578_v58 = vld [vmem:[#allocation10 + $0x1c0] sm:$0xf] }
  0xe6   :  { %1033 = vmatpush.bf16.msra.mxu1 %v1499_v63  ;;  %v1570_v63 = vld [vmem:[#allocation10 + $0x1b0] sm:$0xf] }
  0xea   :  { %1034 = vmatpush.bf16.msra.mxu1 %v1491_v4  ;;  %v1562_v4 = vld [vmem:[#allocation10 + $0x1a0] sm:$0xf] }
  0xeb   :  { %v1563_v8 = vor.u32 %v1717_v6, %v1562_v4 }
  0xee   :  { %1035 = vmatpush.bf16.msra.mxu1 %v1483_v11 }
  0xff   :  { %v351_v10 = vpop.f32.mrf.mxu2 }
 0x100   :  { %v352_v50 = vadd.f32 %v351_v10, %v150_v42  ;;  %v1715_v10 = vld [vmem:[#allocation10 + $0x194] sm:$0xf0]  ;;  %v151_v42 = vperm.slane %v1990_v13, 3 }
 0x101   :  { %v1555_v14 = vor.u32 %v1715_v10, %v1554_v9 }
 0x107   :  { %v353_v18 = vpop.f32.mrf.mxu2 }
 0x108   :  { %v1726_v18 = vld [vmem:[#allocation10 + $0x1f4] sm:$0xf] }
 0x109   :  { %v1607_v21 = vor.u32 %v1726_v18, %v1604_v19 }
 0x140   :  { %v443_v38 = vpop.f32.mrf.mxu0 }
 0x141   :  { %v447_v40 = vadd.f32 %v443_v38, %v339_v32  ;;  %v1698_v32 = vld [vmem:[#allocation10 + $0x114] sm:$0xf]  ;;  %v676_v38 = vld [vmem:[#allocation11] sm:$0x3] }
 0x142   :  { %v1495_v34 = vor.u32 %v1698_v32, %v1492_v33  ;;  %v679_v7 = vperm.slane %v676_v38, 1  ;;  %v1716_v33 = vld [vmem:[#allocation10 + $0x1a4] sm:$0xf] }
 0x143   :  { %v448_v45 = vmax.f32 %v447_v40, 0.0  ;;  %v1727_v40 = vld [vmem:[#allocation10 + $0x1f4] sm:$0xf0] }
 0x144   :  { %v1603_v43 = vor.u32 %v1727_v40, %v1602_v39  ;;  %v1712_v39 = vld [vmem:[#allocation10 + $0x184] sm:$0xf]  ;;  %v1548_v40 = vld [vmem:[#allocation10 + $0x188] sm:$0xf0] }
 0x145   :  { %v449_v46 = vpack.c.bf16 %v448_v45, %v448_v45  ;;  %v678_v45 = vperm.slane %v676_v38, 0 }
 0x146   :  { %v2000_v48 = vpop.f32.mrf.mxu3  ;;  %1041 = vmatpush.bf16.msra.mxu2 %v1603_v43 }
 0x147   :  { %523 = vmatmul.bf16.vlgmr.msrb.gmra.mxu1 %v449_v46  ;;  %1023 = vmatmul.bf16.vlgmr.msra.gmra.mxu0 %v449_v46  ;;  %v1012_v51 = vadd.f32 %v2000_v48, %v678_v45  ;;  %v1571_v48 = vor.u32 %v1719_v1, %v1570_v63  ;;  %v365_v45 = vadd.f32 %v1995_v53, %v151_v42 }
 0x148   :  { %v445_v52 = vpop.f32.mrf.mxu0  ;;  %1080 = vmatpush.bf16.msrb.mxu1 %v1543_v12 }
 0x149   :  { %v1587_v52 = vor.u32 %v1723_v49, %v1586_v47 }
 0x14c   :  { %1081 = vmatpush.bf16.msrb.mxu1 %v1535_v17  ;;  %v1713_v17 = vld [vmem:[#allocation10 + $0x184] sm:$0xf0] }
 0x14e   :  { %v1013_v59 = vpop.f32.mrf.mxu3 }
 0x14f   :  { %v1721_v59 = vld [vmem:[#allocation10 + $0x1c4] sm:$0xf0] }
 0x150   :  { %1082 = vmatpush.bf16.msrb.mxu1 %v1527_v22  ;;  %v1579_v61 = vor.u32 %v1721_v59, %v1578_v58 }
 0x154   :  { %1083 = vmatpush.bf16.msrb.mxu1 %v1519_v25  ;;  %v1588_v25 = vld [vmem:[#allocation10 + $0x1d8] sm:$0xf0] }
 0x156   :  { %v2002_v5 = vpop.f32.mrf.mxu3 }
 0x157   :  { %1075 = vmatmul.bf16.vlgmr.msrb.gmra.mxu0 %v449_v46  ;;  %v1595_v46 = vor.u32 %v1725_v44, %v1594_v41  ;;  %v1064_v11 = vadd.f32 %v2002_v5, %v679_v7  ;;  %v1722_v5 = vld [vmem:[#allocation10 + $0x1d4] sm:$0xf]  ;;  %v1551_v41 = vor.u32 %v1712_v39, %v1548_v40 }
 0x158   :  { %1084 = vmatpush.bf16.msrb.mxu1 %v1511_v28  ;;  %v1591_v26 = vor.u32 %v1722_v5, %v1588_v25  ;;  %v1580_v28 = vld [vmem:[#allocation10 + $0x1c8] sm:$0xf0] }
 0x159   :  { %1042 = vmatpush.bf16.msra.mxu2 %v1595_v46  ;;  %v1583_v29 = vor.u32 %v1720_v27, %v1580_v28 }
 0x15c   :  { %1085 = vmatpush.bf16.msrb.mxu1 %v1503_v31  ;;  %v1572_v31 = vld [vmem:[#allocation10 + $0x1b8] sm:$0xf0] }
 0x15d   :  { %1043 = vmatpush.bf16.msra.mxu2 %v1587_v52  ;;  %v1575_v32 = vor.u32 %v1718_v30, %v1572_v31 }
 0x15e   :  { %v1065_v16 = vpop.f32.mrf.mxu3 }
 0x15f   :  { %v1546_v16 = vld [vmem:[#allocation10 + $0x180] sm:$0xf] }
 0x160   :  { %1086 = vmatpush.bf16.msrb.mxu1 %v1495_v34  ;;  %v1547_v20 = vor.u32 %v1713_v17, %v1546_v16  ;;  %v1564_v34 = vld [vmem:[#allocation10 + $0x1a8] sm:$0xf0] }
 0x161   :  { %1044 = vmatpush.bf16.msra.mxu2 %v1579_v61  ;;  %v1567_v35 = vor.u32 %v1716_v33, %v1564_v34 }
 0x164   :  { %1087 = vmatpush.bf16.msrb.mxu1 %v1487_v37  ;;  %v1556_v37 = vld [vmem:[#allocation10 + $0x198] sm:$0xf0] }
 0x165   :  { %1045 = vmatpush.bf16.msra.mxu2 %v1571_v48  ;;  %v1559_v38 = vor.u32 %v1714_v36, %v1556_v37 }
 0x169   :  { %1046 = vmatpush.bf16.msra.mxu2 %v1563_v8 }
 0x16d   :  { %1047 = vmatpush.bf16.msra.mxu2 %v1555_v14 }
 0x171   :  { %1048 = vmatpush.bf16.msra.mxu2 %v1547_v20 }
 0x1c4   :  { %v524_v54 = vpop.f32.mrf.mxu1  ;;  %v1024_v55 = vpop.f32.mrf.mxu0 }
 0x1c5   :  { %v528_v56 = vadd.f32 %v524_v54, %v352_v50  ;;  %v2006_v57 = vadd.f32 %v1024_v55, %v1012_v51 }
 0x1c7   :  { %v529_v60 = vmax.f32 %v528_v56, 0.0 }
 0x1c9   :  { %v530_v62 = vpack.c.bf16 %v529_v60, %v529_v60 }
 0x1cb   :  { %604 = vmatmul.bf16.vlgmr.msrb.gmra.mxu2 %v530_v62  ;;  %1036 = vmatmul.bf16.vlgmr.msra.gmra.mxu1 %v530_v62 }
 0x1cc   :  { %v526_v2 = vpop.f32.mrf.mxu1  ;;  %v1026_v3 = vpop.f32.mrf.mxu0  ;;  %1093 = vmatpush.bf16.msrb.mxu2 %v1607_v21 }
 0x1d0   :  { %1094 = vmatpush.bf16.msrb.mxu2 %v1599_v24 }
 0x1d4   :  { %v1076_v12 = vpop.f32.mrf.mxu0  ;;  %1095 = vmatpush.bf16.msrb.mxu2 %v1591_v26 }
 0x1d5   :  { %v1077_v15 = vadd.f32 %v1076_v12, %v1064_v11 }
 0x1d8   :  { %1096 = vmatpush.bf16.msrb.mxu2 %v1583_v29 }
 0x1db   :  { %1088 = vmatmul.bf16.vlgmr.msrb.gmra.mxu1 %v530_v62 }
 0x1dc   :  { %v1078_v22 = vpop.f32.mrf.mxu0  ;;  %1097 = vmatpush.bf16.msrb.mxu2 %v1575_v32 }
 0x1e0   :  { %1098 = vmatpush.bf16.msrb.mxu2 %v1567_v35 }
 0x1e4   :  { %1099 = vmatpush.bf16.msrb.mxu2 %v1559_v38 }
 0x1e8   :  { %1100 = vmatpush.bf16.msrb.mxu2 %v1551_v41 }
 0x248   :  { %v1037_v43 = vpop.f32.mrf.mxu1 }
 0x249   :  { %v1038_v44 = vadd.f32 %v1037_v43, %v2006_v57 }
 0x24e   :  { %v605_v46 = vpop.f32.mrf.mxu2 }
 0x24f   :  { %v609_v47 = vadd.f32 %v605_v46, %v365_v45 }
 0x250   :  { %v1039_v49 = vpop.f32.mrf.mxu1 }
 0x251   :  { %v610_v50 = vmax.f32 %v609_v47, 0.0 }
 0x253   :  { %v611_v51 = vpack.c.bf16 %v610_v50, %v610_v50 }
 0x255   :  { %1049 = vmatmul.bf16.vlgmr.msra.gmra.mxu2 %v611_v51 }
 0x256   :  { %v607_v52 = vpop.f32.mrf.mxu2 }
 0x258   :  { %v1089_v54 = vpop.f32.mrf.mxu1 }
 0x259   :  { %v1090_v55 = vadd.f32 %v1089_v54, %v1077_v15 }
 0x260   :  { %v1091_v56 = vpop.f32.mrf.mxu1 }
 0x265   :  { %1101 = vmatmul.bf16.vlgmr.msrb.gmra.mxu2 %v611_v51 }
 0x2d8   :  { %v1050_v58 = vpop.f32.mrf.mxu2 }
 0x2d9   :  { %v1051_v59 = vadd.f32 %v1050_v58, %v1038_v44 }
 0x2db   :  { %1106 = vst [vmem:[#allocation13] sm:$0xff] %v1051_v59 }
 0x2e0   :  { %v1052_v13 = vpop.f32.mrf.mxu2 }
 0x2e8   :  { %v1102_v53 = vpop.f32.mrf.mxu2 }
 0x2e9   :  { %v1103_v57 = vadd.f32 %v1102_v53, %v1090_v55 }
 0x2eb   :  { %1107 = vst [vmem:[#allocation13 + $0x8] sm:$0xff] %v1103_v57 }
 0x2ec   :  { %1118 = dma.vmem_to_hbm [thread:$0]  %s1114_s5, 256, %s1116_s7, [#allocation4]  }
 0x2f0   :  { %v1104_v60 = vpop.f32.mrf.mxu2 }
 0x2f1   :  { %1917 = dma.done.wait [#allocation4], 256  }
 0x2f2   :  { %1918 = vsyncadd [#allocation4], 4294967040 }
 0x2f3   :  { %1123 = vsyncpa [#allocation3], 1 }
 0x2f4   :  { %1124 = vsyncpa [#allocation6], 1 }
 0x2f5   :  { %1125 = vsyncpa [#allocation9], 1 }
 0x2f6   :  { %1126 = vsyncpa [#allocation12], 1 }
 0x2f7   :  { %1127 = vsyncpa [#allocation4], 1 }

</bundles_post_ra>
